<compile_context>
chip_gen: v7x
topology: tpu7x:2x2x1
jax: 0.10.0
libtpu: 0.0.40
codegen_flags: <defaults>
</compile_context>

<pallas_src>
from math import exp

import numpy as np
import jax
import jax.numpy as jnp
from jax.experimental import pallas as pl
from jax.experimental.pallas import tpu as pltpu


def _gaussian_1d(window_size, sigma=1.5):
    """1-D Gaussian exactly as gaussian() in the module (incl. the 1e-6 terms)."""
    g = np.array(
        [exp(-(x - window_size // 2) ** 2 / float(2 * sigma ** 2 + 1e-06))
         for x in range(window_size)],
        dtype=np.float32,
    )
    return g / (g.sum(dtype=np.float32) + np.float32(1e-06))


def _round_up(x, m):
    return ((x + m - 1) // m) * m


def _cdiv(a, b):
    return -(-a // b)


def _vmem_capacity_bytes():
    try:
        return int(pltpu.get_tpu_info().vmem_capacity_bytes)
    except Exception:
        return 64 << 20          # conservative fallback (v7x per-TC VMEM)


def _choose_packing(n_planes, rp, rop, cdim, co, vmem_cap):
    """Pick planes-per-grid-step P from a per-step working-set model."""
    def footprint(p):
        in_db = 2 * 2 * p * rp * cdim * 4            # x1/x2 blocks, double-buffered, f32
        stack = 5 * p * rp * cdim * 2                # fused bf16 [a,b,a2,b2,ab] stack
        tbuf = 5 * p * rp * co * (4 + 2)             # W-pass out (f32) + bf16 copy
        zbuf = 5 * p * rop * co * 4                  # H-pass out (f32)
        elem = 10 * p * rop * co * 4                 # ssim-map temporaries (f32)
        ghbd = (5 * p * rop) * (5 * p * rp) * 2      # block-diagonal H-pass matrix (bf16)
        sel = p * (p * rop) * 4                      # plane-sum selector (f32)
        gwb = cdim * co * 2
        return in_db + stack + tbuf + zbuf + elem + ghbd + sel + gwb

    budget = int(vmem_cap * 0.45)
    pmax = 1
    while pmax < n_planes:
        nxt = pmax + 1
        if footprint(nxt) > budget:
            break
        if 5 * nxt * rp > 2048:                      # keep block-diag H-pass matmul sane
            break
        if (5 * nxt * rop) * (5 * nxt * rp) * 2 > (4 << 20):
            break
        pmax = nxt

    # >= 2 grid steps whenever possible: megacore split on v7x plus
    # DMA/compute overlap; costs only ~0.35 us/step on v5e/v6e.
    min_steps = 2 if n_planes >= 2 else 1
    p = max(1, min(pmax, _cdiv(n_planes, min_steps)))
    num_blocks = _cdiv(n_planes, p)
    n_pad = num_blocks * p
    return p, num_blocks, n_pad, footprint(p)


def _ssim_kernel(c_ref, gw_ref, ghbd_ref, sel_ref, x1_ref, x2_ref, out_ref):
    """One grid step processes P packed image planes, fully 2-D.

    c_ref   : SMEM f32[2]                       (C1, C2)
    gw_ref  : VMEM blur[Cdim, Co]               lane-direction valid-conv pass
    ghbd_ref: VMEM blur[5P*Rop, 5P*Rp]          block-diag sublane-direction pass
    sel_ref : VMEM f32[P, P*Rop]                per-plane row-sum selector (masks pad rows)
    x*_ref  : VMEM f32[P*Rp, Cdim]              P packed planes of img1 / img2
    out_ref : VMEM f32[1, P, 1]                 per-plane sum(ssim_map)
    """
    c1 = c_ref[0]
    c2 = c_ref[1]
    a = x1_ref[...]
    b = x2_ref[...]

    # Fused blur of the 5-way stack; constant operands are never replicated.
    stack = jnp.concatenate([a, b, a * a, b * b, a * b], axis=0)
    stack = stack.astype(gw_ref.dtype)
    t = jnp.dot(stack, gw_ref[...], preferred_element_type=jnp.float32)   # (5P*Rp, Co)
    z = jnp.dot(ghbd_ref[...], t.astype(ghbd_ref.dtype),
                preferred_element_type=jnp.float32)                       # (5P*Rop, Co)

    n = sel_ref.shape[1]                      # P * Rop (multiple of 8 -> aligned slices)
    mu1 = z[0 * n:1 * n]
    mu2 = z[1 * n:2 * n]
    s11 = z[2 * n:3 * n]
    s22 = z[3 * n:4 * n]
    s12 = z[4 * n:5 * n]

    mu1_sq = mu1 * mu1
    mu2_sq = mu2 * mu2
    mu1_mu2 = mu1 * mu2
    sigma1_sq = s11 - mu1_sq
    sigma2_sq = s22 - mu2_sq
    sigma12 = s12 - mu1_mu2

    v1 = 2.0 * sigma12 + c2
    v2 = sigma1_sq + sigma2_sq + c2 + 1e-08
    # Exact divide kept (approx reciprocal is a numerics risk for a loss).
    ssim_map = (2.0 * mu1_mu2 + c1) * v1 / ((mu1_sq + mu2_sq + c1) * v2 + 1e-06)

    # Per-plane sums.  The selector also zeroes the Rop-padding rows.
    red = jnp.dot(sel_ref[...], ssim_map, preferred_element_type=jnp.float32)  # (P, Co)
    ps = jnp.sum(red, axis=1, keepdims=True)                                   # (P, 1)
    out_ref[0] = ps


def ssim_pallas(img1, img2, window_size=11, size_average=True, val_range=None,
                blur_dtype=jnp.bfloat16):
    """Forward pass of the SSIM module on TPU via Pallas."""
    B, Cch, H, W = img1.shape
    K = min(window_size, H, W)   # == window_size whenever H, W >= window_size

    # Data-dependent val_range (Python `if` on tensor values in PyTorch).
    # NOTE: this is an extra full HBM pass over img1 before the kernel; pass
    # val_range explicitly in hot loops.
    if val_range is None:
        max_val = jnp.where(jnp.max(img1) > 128, 255.0, 1.0)
        min_val = jnp.where(jnp.min(img1) < -0.5, -1.0, 0.0)
        L = (max_val - min_val).astype(jnp.float32)
    else:
        L = jnp.float32(val_range)
    c1 = (0.01 * L) ** 2
    c2 = (0.03 * L) ** 2
    c12 = jnp.stack([c1, c2]).astype(jnp.float32)

    # Lane-dense layout: put the longer spatial dim on the lane (last) axis.
    transpose_plane = H > W
    R, Cdim = (W, H) if transpose_plane else (H, W)
    Ro, Co = R - K + 1, Cdim - K + 1
    Rp, Rop = _round_up(R, 8), _round_up(Ro, 8)

    N = B * Cch
    vmem_cap = _vmem_capacity_bytes()
    P, num_blocks, N_pad, footprint = _choose_packing(N, Rp, Rop, Cdim, Co, vmem_cap)
    vmem_limit = int(min(vmem_cap, max(32 << 20, 2 * footprint)))

    # Constant matrices (built once, shared across all grid steps).
    g = _gaussian_1d(K)
    gw = np.zeros((Cdim, Co), np.float32)
    for o in range(Co):
        gw[o:o + K, o] = g
    gh = np.zeros((Rop, Rp), np.float32)          # pad rows/cols are zero
    for o in range(Ro):
        gh[o, o:o + K] = g
    ghbd = np.zeros((5 * P * Rop, 5 * P * Rp), np.float32)
    for i in range(5 * P):
        ghbd[i * Rop:(i + 1) * Rop, i * Rp:(i + 1) * Rp] = gh
    sel = np.zeros((P, P * Rop), np.float32)
    for p in range(P):
        sel[p, p * Rop:p * Rop + Ro] = 1.0

    gw_j = jnp.asarray(gw).astype(blur_dtype)
    ghbd_j = jnp.asarray(ghbd).astype(blur_dtype)
    sel_j = jnp.asarray(sel)

    # Plane packing: (B, C, H, W) -> (N_pad * Rp, Cdim) with zero padding for
    # the row round-up and for awkward plane counts (padded planes sliced off
    # after the kernel -- their ssim map is ~1 per pixel, not 0).
    x1 = img1.reshape(N, H, W).astype(jnp.float32)
    x2 = img2.reshape(N, H, W).astype(jnp.float32)
    if transpose_plane:
        x1 = x1.transpose(0, 2, 1)
        x2 = x2.transpose(0, 2, 1)
    pad_planes, pad_rows = N_pad - N, Rp - R
    if pad_planes or pad_rows:
        pads = ((0, pad_planes), (0, pad_rows), (0, 0))
        x1 = jnp.pad(x1, pads)
        x2 = jnp.pad(x2, pads)
    x1 = x1.reshape(N_pad * Rp, Cdim)
    x2 = x2.reshape(N_pad * Rp, Cdim)

    out = pl.pallas_call(
        _ssim_kernel,
        out_shape=jax.ShapeDtypeStruct((num_blocks, P, 1), jnp.float32),
        grid=(num_blocks,),
        in_specs=[
            pl.BlockSpec(memory_space=pltpu.MemorySpace.SMEM),          # (C1, C2)
            pl.BlockSpec((Cdim, Co), lambda s: (0, 0)),                 # Gw (shared)
            pl.BlockSpec((5 * P * Rop, 5 * P * Rp), lambda s: (0, 0)),  # block-diag Gh
            pl.BlockSpec((P, P * Rop), lambda s: (0, 0)),               # plane-sum selector
            pl.BlockSpec((P * Rp, Cdim), lambda s: (s, 0)),             # img1 planes
            pl.BlockSpec((P * Rp, Cdim), lambda s: (s, 0)),             # img2 planes
        ],
        out_specs=pl.BlockSpec((1, P, 1), lambda s: (s, 0, 0)),
        compiler_params=pltpu.CompilerParams(
            dimension_semantics=("parallel",),
            vmem_limit_bytes=vmem_limit,
        ),
    )(c12, gw_j, ghbd_j, sel_j, x1, x2)

    psums = out.reshape(N_pad)[:N]          # drop zero-padded planes
    denom = jnp.float32(Ro * Co)
    if size_average:
        return jnp.sum(psums) / (jnp.float32(N) * denom)
    # size_average=False: per-batch-element mean over (C, Ho, Wo).
    return psums.reshape(B, Cch).sum(axis=1) / (jnp.float32(Cch) * denom)


if __name__ == "__main__":
    key = jax.random.PRNGKey(0)
    k1, k2 = jax.random.split(key)
    B, C, H, W = 2, 4, 16, 16
    img1 = jax.random.uniform(k1, (B, C, H, W), dtype=jnp.float32)
    img2 = jax.random.uniform(k2, (B, C, H, W), dtype=jnp.float32)

    out = ssim_pallas(img1, img2)
    jax.block_until_ready(out)
    print("KERNEL_OK")
</pallas_src>

<mosaic_0001>
module attributes {stable_mosaic.version = 11 : i64} {
  func.func @_ssim_kernel(%arg0: i32, %arg1: memref<2xf32, #tpu.memory_space<smem>>, %arg2: memref<16x6xbf16, #tpu.memory_space<vmem>>, %arg3: memref<160x320xbf16, #tpu.memory_space<vmem>>, %arg4: memref<4x32xf32, #tpu.memory_space<vmem>>, %arg5: memref<64x16xf32, #tpu.memory_space<vmem>>, %arg6: memref<64x16xf32, #tpu.memory_space<vmem>>, %arg7: memref<1x4x1xf32, #tpu.memory_space<vmem>>) attributes {dimension_semantics = [#tpu.dimension_semantics<parallel>], iteration_bounds = array<i64: 2>, scalar_prefetch = 0 : i64, scratch_operands = 0 : i64, tpu.core_type = #tpu.core_type<tc>, window_params = [{transform_indices = @transform_0, window_bounds = array<i64: 2>}, {pipeline_mode = #tpu.pipeline_mode<synchronous>, transform_indices = @transform_1, window_bounds = array<i64: 16, 6>}, {pipeline_mode = #tpu.pipeline_mode<synchronous>, transform_indices = @transform_2, window_bounds = array<i64: 160, 320>}, {pipeline_mode = #tpu.pipeline_mode<synchronous>, transform_indices = @transform_3, window_bounds = array<i64: 4, 32>}, {transform_indices = @transform_4, window_bounds = array<i64: 64, 16>}, {transform_indices = @transform_5, window_bounds = array<i64: 64, 16>}, {transform_indices = @transform_6, window_bounds = array<i64: 1, 4, 1>}]} {
    %c0 = arith.constant 0 : index
    %0 = memref.load %arg1[%c0] : memref<2xf32, #tpu.memory_space<smem>>
    %c1 = arith.constant 1 : index
    %1 = memref.load %arg1[%c1] : memref<2xf32, #tpu.memory_space<smem>>
    %c0_0 = arith.constant 0 : index
    %c0_1 = arith.constant 0 : index
    %2 = vector.load %arg5[%c0_0, %c0_1] : memref<64x16xf32, #tpu.memory_space<vmem>>, vector<64x16xf32>
    %c0_2 = arith.constant 0 : index
    %c0_3 = arith.constant 0 : index
    %3 = vector.load %arg6[%c0_2, %c0_3] : memref<64x16xf32, #tpu.memory_space<vmem>>, vector<64x16xf32>
    %4 = arith.mulf %2, %2 : vector<64x16xf32>
    %5 = arith.mulf %3, %3 : vector<64x16xf32>
    %6 = arith.mulf %2, %3 : vector<64x16xf32>
    %7 = tpu.concatenate %2, %3, %4, %5, %6 in 0 : vector<64x16xf32>, vector<64x16xf32>, vector<64x16xf32>, vector<64x16xf32>, vector<64x16xf32> -> vector<320x16xf32>
    %8 = arith.truncf %7 : vector<320x16xf32> to vector<320x16xbf16>
    %c0_4 = arith.constant 0 : index
    %c0_5 = arith.constant 0 : index
    %9 = vector.load %arg2[%c0_4, %c0_5] : memref<16x6xbf16, #tpu.memory_space<vmem>>, vector<16x6xbf16>
    %cst = arith.constant dense<0.000000e+00> : vector<320x6xf32>
    %10 = tpu.matmul %8, %9, %cst {dimension_numbers = #tpu.dot_dimension_numbers<[1], [0], [0], [1], [0, 0, 1, 1], [], []>} : vector<320x16xbf16>, vector<16x6xbf16>, vector<320x6xf32> -> vector<320x6xf32>
    %c0_6 = arith.constant 0 : index
    %c0_7 = arith.constant 0 : index
    %11 = vector.load %arg3[%c0_6, %c0_7] : memref<160x320xbf16, #tpu.memory_space<vmem>>, vector<160x320xbf16>
    %12 = arith.truncf %10 : vector<320x6xf32> to vector<320x6xbf16>
    %cst_8 = arith.constant dense<0.000000e+00> : vector<160x6xf32>
    %13 = tpu.matmul %11, %12, %cst_8 {dimension_numbers = #tpu.dot_dimension_numbers<[1], [0], [0], [1], [0, 0, 1, 1], [], []>} : vector<160x320xbf16>, vector<320x6xbf16>, vector<160x6xf32> -> vector<160x6xf32>
    %14 = vector.extract_strided_slice %13 {offsets = [0, 0], sizes = [32, 6], strides = [1, 1]} : vector<160x6xf32> to vector<32x6xf32>
    %15 = vector.extract_strided_slice %13 {offsets = [32, 0], sizes = [32, 6], strides = [1, 1]} : vector<160x6xf32> to vector<32x6xf32>
    %16 = vector.extract_strided_slice %13 {offsets = [64, 0], sizes = [32, 6], strides = [1, 1]} : vector<160x6xf32> to vector<32x6xf32>
    %17 = vector.extract_strided_slice %13 {offsets = [96, 0], sizes = [32, 6], strides = [1, 1]} : vector<160x6xf32> to vector<32x6xf32>
    %18 = vector.extract_strided_slice %13 {offsets = [128, 0], sizes = [32, 6], strides = [1, 1]} : vector<160x6xf32> to vector<32x6xf32>
    %19 = arith.mulf %14, %14 : vector<32x6xf32>
    %20 = arith.mulf %15, %15 : vector<32x6xf32>
    %21 = arith.mulf %14, %15 : vector<32x6xf32>
    %22 = arith.subf %16, %19 : vector<32x6xf32>
    %23 = arith.subf %17, %20 : vector<32x6xf32>
    %24 = arith.subf %18, %21 : vector<32x6xf32>
    %cst_9 = arith.constant 2.000000e+00 : f32
    %25 = vector.broadcast %cst_9 : f32 to vector<32x6xf32>
    %26 = arith.mulf %25, %24 : vector<32x6xf32>
    %27 = vector.broadcast %1 : f32 to vector<32x6xf32>
    %28 = arith.addf %26, %27 : vector<32x6xf32>
    %29 = arith.addf %22, %23 : vector<32x6xf32>
    %30 = vector.broadcast %1 : f32 to vector<32x6xf32>
    %31 = arith.addf %29, %30 : vector<32x6xf32>
    %cst_10 = arith.constant 9.99999993E-9 : f32
    %32 = vector.broadcast %cst_10 : f32 to vector<32x6xf32>
    %33 = arith.addf %31, %32 : vector<32x6xf32>
    %cst_11 = arith.constant 2.000000e+00 : f32
    %34 = vector.broadcast %cst_11 : f32 to vector<32x6xf32>
    %35 = arith.mulf %34, %21 : vector<32x6xf32>
    %36 = vector.broadcast %0 : f32 to vector<32x6xf32>
    %37 = arith.addf %35, %36 : vector<32x6xf32>
    %38 = arith.mulf %37, %28 : vector<32x6xf32>
    %39 = arith.addf %19, %20 : vector<32x6xf32>
    %40 = vector.broadcast %0 : f32 to vector<32x6xf32>
    %41 = arith.addf %39, %40 : vector<32x6xf32>
    %42 = arith.mulf %41, %33 : vector<32x6xf32>
    %cst_12 = arith.constant 9.99999997E-7 : f32
    %43 = vector.broadcast %cst_12 : f32 to vector<32x6xf32>
    %44 = arith.addf %42, %43 : vector<32x6xf32>
    %45 = arith.divf %38, %44 : vector<32x6xf32>
    %c0_13 = arith.constant 0 : index
    %c0_14 = arith.constant 0 : index
    %46 = vector.load %arg4[%c0_13, %c0_14] : memref<4x32xf32, #tpu.memory_space<vmem>>, vector<4x32xf32>
    %cst_15 = arith.constant dense<0.000000e+00> : vector<4x6xf32>
    %47 = tpu.matmul %46, %45, %cst_15 {dimension_numbers = #tpu.dot_dimension_numbers<[1], [0], [0], [1], [0, 0, 1, 1], [], []>} : vector<4x32xf32>, vector<32x6xf32>, vector<4x6xf32> -> vector<4x6xf32>
    %cst_16 = arith.constant dense<0.000000e+00> : vector<4xf32>
    %48 = vector.multi_reduction <add>, %47, %cst_16 [1] : vector<4x6xf32> to vector<4xf32>
    %49 = vector.shape_cast %48 : vector<4xf32> to vector<4x1xf32>
    %c0_17 = arith.constant 0 : index
    %c0_18 = arith.constant 0 : index
    %c0_19 = arith.constant 0 : index
    %50 = vector.load %arg7[%c0_17, %c0_18, %c0_19] : memref<1x4x1xf32, #tpu.memory_space<vmem>>, vector<1x4x1xf32>
    %51 = vector.shape_cast %50 : vector<1x4x1xf32> to vector<4x1xf32>
    %52 = vector.shape_cast %49 : vector<4x1xf32> to vector<1x4x1xf32>
    tpu.vector_store %arg7[%c0_17, %c0_18, %c0_19], %52 {strides = array<i32>} : memref<1x4x1xf32, #tpu.memory_space<vmem>>, vector<1x4x1xf32>,
    return
  }
  func.func @transform_0(%arg0: i32) -> i32 {
    %c0_i32 = arith.constant 0 : i32
    %c0_i32_0 = arith.constant 0 : i32
    return %c0_i32 : i32
  }
  func.func @transform_1(%arg0: i32) -> (i32, i32) {
    %c0_i32 = arith.constant 0 : i32
    %c0_i32_0 = arith.constant 0 : i32
    %c0_i32_1 = arith.constant 0 : i32
    return %c0_i32, %c0_i32_0 : i32, i32
  }
  func.func @transform_2(%arg0: i32) -> (i32, i32) {
    %c0_i32 = arith.constant 0 : i32
    %c0_i32_0 = arith.constant 0 : i32
    %c0_i32_1 = arith.constant 0 : i32
    return %c0_i32, %c0_i32_0 : i32, i32
  }
  func.func @transform_3(%arg0: i32) -> (i32, i32) {
    %c0_i32 = arith.constant 0 : i32
    %c0_i32_0 = arith.constant 0 : i32
    %c0_i32_1 = arith.constant 0 : i32
    return %c0_i32, %c0_i32_0 : i32, i32
  }
  func.func @transform_4(%arg0: i32) -> (i32, i32) {
    %c0_i32 = arith.constant 0 : i32
    %c0_i32_0 = arith.constant 0 : i32
    return %arg0, %c0_i32 : i32, i32
  }
  func.func @transform_5(%arg0: i32) -> (i32, i32) {
    %c0_i32 = arith.constant 0 : i32
    %c0_i32_0 = arith.constant 0 : i32
    return %arg0, %c0_i32 : i32, i32
  }
  func.func @transform_6(%arg0: i32) -> (i32, i32, i32) {
    %c0_i32 = arith.constant 0 : i32
    %c0_i32_0 = arith.constant 0 : i32
    %c0_i32_1 = arith.constant 0 : i32
    return %arg0, %c0_i32, %c0_i32_0 : i32, i32, i32
  }
}

</mosaic_0001>

<bundles_post_ra>
// kernel: tpu_custom_call.1
= control target key start
LH: loop header
LB: loop body
LE: loop exit
PB: predicated region body
PF: predicated region fallthrough
CT: control target
= control target key end

     0   :  { %11 = vsyncpa [#allocation3], 0  ;;  %s1737_s21 = smov 0   ;;  %s2019_s0 = inlined_call_operand.vmem [shape: f32[2], index: 0, kind: input, shape index: {}]   ;;  %s2020_s1 = inlined_call_operand.vmem [shape: bf16[16,6], index: 1, kind: input, shape index: {}]   ;;  %s2021_s2 = inlined_call_operand.vmem [shape: bf16[160,320], index: 2, kind: input, shape index: {}]   ;;  %s2022_s3 = inlined_call_operand.vmem [shape: f32[4,32], index: 3, kind: input, shape index: {}]   ;;  %s2023_s4 = inlined_call_operand.vmem [shape: f32[128,16], index: 4, kind: input, shape index: {}]   ;;  %s2024_s5 = inlined_call_operand.vmem [shape: f32[128,16], index: 5, kind: input, shape index: {}]   ;;  %s2025_s6 = inlined_call_operand.vmem [shape: f32[2,4,1], index: 6, kind: output, shape index: {}]  }
   0x1 LB: > { %s1743_s22 = sadd.s32 4294967295, %s1696_s21   ;;  %p1322_p0 = scmp.ge.s32.totalorder %s1696_s21, 1  ;;  %s1696_s21 = sphi %s1737_s21, %s17_s21  }
   0x2   : > { %p184_p1 = scmp.lt.s32.totalorder %s1696_s21, 3  ;;  %s197_s25 = sshll.u32 %s2019_s0, 4  ;;  %s198_s25 = int_to_ptr.vmem [resolvable:$true] %s197_s25 }
   0x3   : > { %p1608_p3 = scmp.eq.s32.totalorder %s1743_s22, 0  ;;  %s1671_s27 = scalar_lea.vmem %s198_s25, 16 }
   0x4   : > { %p1750_p2 = pnand %p1322_p0, %p184_p1  ;;  %p1672_p6 = scmp.ne.s32.totalorder %s198_s25, %s1671_s27 }
   0x5   : > { %p1679_p10 = scmp.lt.s32.totalorder %s198_s25, %s198_s25  ;;  %p1680_p11 = scmp.lt.s32.totalorder %s1671_s27, %s1671_s27 }
   0x6   : > { %p1604_p4 = pneg %p1750_p2 }
   0x7   : > { %p1681_p12 = por %p1680_p11, %p1679_p10 }
   0x8   : > { %p1605_p5 = pnand %p1608_p3, %p1604_p4 }
   0xa   : > { %p1673_p7 = pneg %p1605_p5 }
   0xc   : > { %p1674_p8 = pnand %p1673_p7, %p1672_p6 }
   0xe   : > { %p1675_p9 = pneg %p1674_p8 }
  0x10   : > { %p1682_p13 = pnand %p1681_p12, %p1675_p9 }
  0x12   : > { %1685 = shalt.err (!%p1682_p13)
}
  0x13   : > { %s1698_s28 = smov [#allocation2]   ;;  %237 = sbr.rel (%p1750_p2) target bundleno = 982 (0x3d6), region = 44 }
  0x14   : > { %1607 = dma.vmem_to_smem (!%p1605_p5), %s198_s25, 16, %s1698_s28, [#allocation3]  }
  0x1a   : > { %1691 = dma.done.wait (%p1608_p3), [#allocation3], 16  }
  0x1b   : > { %1693 = vsyncadd (%p1608_p3), [#allocation3], 4294967280 }
  0x1c   : > { %243 = sfence }
  0x1d   : > { %v1622_v0 = vld [vmem:[%s2020_s1] sm:$0xff]   ;;  %s1327_s7 = sshll.u32 %s1743_s22, 3  ;;  %vm359_vm0 = vcmask 130048   ;;  %v1631_v62 = vld [vmem:[%s2021_s2 + $0x8] ss:$12 sps:$4 sm:$0xff]   ;;  %vm823_vm1 = vcmask 523264  }
  0x1e   : > { %p273_p0 = scmp.lt.s32.totalorder %s1327_s7, 15  ;;  %1513 = vmatprep.subr.bf16.mxu0 %v1622_v0  ;;  %v1625_v61 = vld [vmem:[%s2021_s2 + $0x4] ss:$12 sps:$4 sm:$0xff]   ;;  %vm1700_vm2 = vmmov 0   ;;  %s1332_s9 = sld [smem:[#allocation2 + $0x1]]  ;;  %vm1163_vm3 = vcmask 261120  }
  0x1f   : > { %1514 = vmatpush3.bf16.msra.mxu0 %v1622_v0  ;;  %886 = vmatprep.mubr.bf16.mxu1 %v1625_v61  ;;  %v1629_v61 = vld [vmem:[%s2021_s2 + $0x34] ss:$12 sps:$4 sm:$0xff]   ;;  %s289_s10 = sld [smem:[#allocation2]]  ;;  %vm1237_vm4 = vcmask 44032   ;;  %p284_p1 = scmp.lt.s32.totalorder %s1743_s22, 1  ;;  %vm1241_vm5 = vcmask 3072  }
  0x20   : > { %s2028_s7 = smov (!%p273_p0, %s1327_s7), 15 }
  0x21   : > { %s1328_s8 = sshll.u32 %s2028_s7, 3  ;;  %s2030_s22 = smov (!%p284_p1, %s1743_s22), 1 }
  0x22   : > { %s276_s11 = scalar_lea.vmem %s2023_s4, %s1328_s8  ;;  %s282_s14 = scalar_lea.vmem %s2024_s5, %s1328_s8 }
  0x23   : > { %v1772_v1 = vld [vmem:[%s276_s11] sm:$0xff]  ;;  %v1774_v2 = vld [vmem:[%s276_s11 + $0x8] sm:$0xff]  ;;  %v1781_v4 = vld [vmem:[%s276_s11 + $0x10] sm:$0xff]  ;;  %s1331_s13 = sshll.u32 %s2030_s22, 2 }
  0x24   : > { %v331_v3 = vpack.c.bf16 %v1774_v2, %v1772_v1  ;;  %v1783_v5 = vld [vmem:[%s276_s11 + $0x18] sm:$0xff]  ;;  %v1787_v7 = vld [vmem:[%s276_s11 + $0x20] sm:$0xff]  ;;  %v1789_v8 = vld [vmem:[%s276_s11 + $0x28] sm:$0xff]  ;;  %v307_v22 = vmul.f32 %v1772_v1, %v1772_v1  ;;  %v308_v23 = vmul.f32 %v1774_v2, %v1774_v2  ;;  %v309_v28 = vmul.f32 %v1781_v4, %v1781_v4  ;;  %s287_s16 = scalar_lea.vmem %s2025_s6, %s1331_s13 }
  0x25   : > { %v332_v6 = vpack.c.bf16 %v1783_v5, %v1781_v4  ;;  %v333_v9 = vpack.c.bf16 %v1789_v8, %v1787_v7  ;;  %v299_v10 = vld [vmem:[%s282_s14] sm:$0xff]  ;;  %v300_v11 = vld [vmem:[%s282_s14 + $0x8] sm:$0xff]  ;;  %v297_v12 = vld [vmem:[%s276_s11 + $0x30] sm:$0xff]  ;;  %v310_v29 = vmul.f32 %v1783_v5, %v1783_v5  ;;  %v311_v30 = vmul.f32 %v1787_v7, %v1787_v7 }
  0x26   : > { %1515 = vmatprep.mubr.msk.bf16.mxu0 %vm359_vm0, %v331_v3  ;;  %v298_v13 = vld [vmem:[%s276_s11 + $0x38] sm:$0xff]  ;;  %v335_v15 = vpack.c.bf16 %v300_v11, %v299_v10  ;;  %v301_v16 = vld [vmem:[%s282_s14 + $0x10] sm:$0xff]  ;;  %v303_v18 = vld [vmem:[%s282_s14 + $0x20] sm:$0xff]  ;;  %v339_v27 = vpack.c.bf16 %v308_v23, %v307_v22  ;;  %v312_v31 = vmul.f32 %v1789_v8, %v1789_v8  ;;  %v313_v34 = vmul.f32 %v297_v12, %v297_v12 }
  0x27   : > { %1516 = vmatmul.mubr.msk.bf16.vlgmr.msra.gmra.mrb[0].mxu0 %vm359_vm0, %v332_v6  ;;  %v334_v14 = vpack.c.bf16 %v298_v13, %v297_v12  ;;  %v302_v17 = vld [vmem:[%s282_s14 + $0x18] sm:$0xff]  ;;  %v304_v19 = vld [vmem:[%s282_s14 + $0x28] sm:$0xff]  ;;  %v305_v24 = vld [vmem:[%s282_s14 + $0x30] sm:$0xff]  ;;  %v340_v32 = vpack.c.bf16 %v310_v29, %v309_v28  ;;  %v314_v35 = vmul.f32 %v298_v13, %v298_v13  ;;  %v315_v36 = vmul.f32 %v299_v10, %v299_v10 }
  0x28   : > { %1519 = vmatprep.mubr.msk.bf16.mxu0 %vm359_vm0, %v333_v9  ;;  %v336_v20 = vpack.c.bf16 %v302_v17, %v301_v16  ;;  %v337_v21 = vpack.c.bf16 %v304_v19, %v303_v18  ;;  %v306_v25 = vld [vmem:[%s282_s14 + $0x38] sm:$0xff]  ;;  %v341_v33 = vpack.c.bf16 %v312_v31, %v311_v30  ;;  %v316_v37 = vmul.f32 %v300_v11, %v300_v11 }
  0x29   : > { %v338_v26 = vpack.c.bf16 %v306_v25, %v305_v24  ;;  %v342_v38 = vpack.c.bf16 %v314_v35, %v313_v34  ;;  %v317_v40 = vmul.f32 %v301_v16, %v301_v16  ;;  %v318_v41 = vmul.f32 %v302_v17, %v302_v17 }
  0x2a   : > { %v343_v39 = vpack.c.bf16 %v316_v37, %v315_v36  ;;  %v319_v42 = vmul.f32 %v303_v18, %v303_v18  ;;  %v320_v43 = vmul.f32 %v304_v19, %v304_v19  ;;  %v321_v46 = vmul.f32 %v305_v24, %v305_v24 }
  0x2b   : > { %v344_v44 = vpack.c.bf16 %v318_v41, %v317_v40  ;;  %v322_v47 = vmul.f32 %v306_v25, %v306_v25  ;;  %v323_v48 = vmul.f32 %v299_v10, %v1772_v1  ;;  %v324_v49 = vmul.f32 %v300_v11, %v1774_v2 }
  0x2c   : > { %v345_v45 = vpack.c.bf16 %v320_v43, %v319_v42  ;;  %v325_v52 = vmul.f32 %v301_v16, %v1781_v4  ;;  %v326_v53 = vmul.f32 %v302_v17, %v1783_v5  ;;  %v327_v54 = vmul.f32 %v303_v18, %v1787_v7 }
  0x2d   : > { %v346_v50 = vpack.c.bf16 %v322_v47, %v321_v46  ;;  %v347_v51 = vpack.c.bf16 %v324_v49, %v323_v48  ;;  %v328_v55 = vmul.f32 %v304_v19, %v1789_v8  ;;  %v329_v58 = vmul.f32 %v305_v24, %v297_v12 }
  0x2e   : > { %v348_v56 = vpack.c.bf16 %v326_v53, %v325_v52  ;;  %v330_v59 = vmul.f32 %v306_v25, %v298_v13  ;;  %v1626_v53 = vld [vmem:[%s2021_s2 + $0x1c] ss:$12 sps:$4 sm:$0xff]  }
  0x2f   : > { %1520 = vmatmul.mubr.msk.bf16.gmra.mrb[4].mxu0 %vm359_vm0, %v334_v14  ;;  %v349_v57 = vpack.c.bf16 %v328_v55, %v327_v54 }
  0x30   : > { %1523 = vmatprep.mubr.msk.bf16.mxu0 %vm359_vm0, %v335_v15  ;;  %v350_v60 = vpack.c.bf16 %v330_v59, %v329_v58  ;;  %v1628_v58 = vld [vmem:[%s2021_s2 + $0x18] ss:$12 sps:$4 sm:$0xff]  }
  0x37   : > { %1524 = vmatmul.mubr.msk.bf16.gmra.mrb[8].mxu0 %vm359_vm0, %v336_v20 }
  0x38   : > { %1527 = vmatprep.mubr.msk.bf16.mxu0 %vm359_vm0, %v337_v21 }
  0x3f   : > { %1528 = vmatmul.mubr.msk.bf16.gmra.mrb[12].mxu0 %vm359_vm0, %v338_v26 }
  0x40   : > { %1531 = vmatprep.mubr.msk.bf16.mxu0 %vm359_vm0, %v339_v27 }
  0x47   : > { %1532 = vmatmul.mubr.msk.bf16.gmra.mrb[16].mxu0 %vm359_vm0, %v340_v32 }
  0x48   : > { %1535 = vmatprep.mubr.msk.bf16.mxu0 %vm359_vm0, %v341_v33 }
  0x4f   : > { %1536 = vmatmul.mubr.msk.bf16.gmra.mrb[20].mxu0 %vm359_vm0, %v342_v38 }
  0x50   : > { %1539 = vmatprep.mubr.msk.bf16.mxu0 %vm359_vm0, %v343_v39 }
  0x57   : > { %1540 = vmatmul.mubr.msk.bf16.gmra.mrb[24].mxu0 %vm359_vm0, %v344_v44 }
  0x58   : > { %1543 = vmatprep.mubr.msk.bf16.mxu0 %vm359_vm0, %v345_v45 }
  0x5f   : > { %1544 = vmatmul.mubr.msk.bf16.gmra.mrb[28].mxu0 %vm359_vm0, %v346_v50  ;;  %v1623_v50 = vld [vmem:[%s2021_s2] ss:$12 sps:$4 sm:$0xff]  }
  0x60   : > { %1547 = vmatprep.mubr.msk.bf16.mxu0 %vm359_vm0, %v347_v51 }
  0x67   : > { %1548 = vmatmul.mubr.msk.bf16.gmra.mrb[32].mxu0 %vm359_vm0, %v348_v56 }
  0x68   : > { %1551 = vmatprep.mubr.msk.bf16.mxu0 %vm359_vm0, %v349_v57 }
  0x6f   : > { %1552 = vmatmul.mubr.msk.bf16.gmra.mrb[36].mxu0 %vm359_vm0, %v350_v60 }
  0x70   : > { %1563 = vmatprep.mubr.msk.bf16.mxu0 %vm823_vm1, %v1631_v62 }
  0xfa   : > { %v1517_v63 = vpop.f32.mrb[0].mxu0 }
  0xfb   : > { %v454_v0 = vpop.f32.mrb[1].mxu0 }
  0xfc   : > { %v1518_v1 = vpop.f32.mrb[2].mxu0 }
  0xfd   : > { %v654_v2 = vpack.c.bf16 %v1518_v1, %v1517_v63  ;;  %v457_v3 = vpop.f32.mrb[3].mxu0  ;;  %v1632_v63 = vld [vmem:[%s2021_s2 + $0x30] ss:$12 sps:$4 sm:$0xff]   ;;  %v1634_v1 = vld [vmem:[%s2021_s2 + $0x4c] ss:$12 sps:$4 sm:$0xff]  }
  0xfe   : > { %v653_v4 = vpack.c.bf16 %v457_v3, %v454_v0  ;;  %v1633_v0 = vld [vmem:[%s2021_s2 + $0x20] ss:$12 sps:$4 sm:$0xff]   ;;  %v1637_v3 = vld [vmem:[%s2021_s2 + $0x48] ss:$12 sps:$4 sm:$0xff]  }
 0x102   : > { %v1521_v5 = vpop.f32.mrb[4].mxu0 }
 0x103   : > { %v470_v6 = vpop.f32.mrb[5].mxu0 }
 0x104   : > { %v1522_v7 = vpop.f32.mrb[6].mxu0 }
 0x105   : > { %v656_v8 = vpack.c.bf16 %v1522_v7, %v1521_v5  ;;  %v473_v9 = vpop.f32.mrb[7].mxu0  ;;  %v1639_v5 = vld [vmem:[%s2021_s2 + $0x64] ss:$12 sps:$4 sm:$0xff]   ;;  %v1641_v7 = vld [vmem:[%s2021_s2 + $0x60] ss:$12 sps:$4 sm:$0xff]  }
 0x106   : > { %v655_v10 = vpack.c.bf16 %v473_v9, %v470_v6  ;;  %v1642_v6 = vld [vmem:[%s2021_s2 + $0x68] ss:$12 sps:$4 sm:$0xff]  }
 0x107   : > { %v1644_v9 = vld [vmem:[%s2021_s2 + $0x7c] ss:$12 sps:$4 sm:$0xff]  }
 0x10a   : > { %v1525_v11 = vpop.f32.mrb[8].mxu0 }
 0x10b   : > { %v486_v12 = vpop.f32.mrb[9].mxu0 }
 0x10c   : > { %v1526_v13 = vpop.f32.mrb[10].mxu0 }
 0x10d   : > { %v658_v14 = vpack.c.bf16 %v1526_v13, %v1525_v11  ;;  %v489_v15 = vpop.f32.mrb[11].mxu0  ;;  %v1646_v11 = vld [vmem:[%s2021_s2 + $0x78] ss:$12 sps:$4 sm:$0xff]   ;;  %v1647_v13 = vld [vmem:[%s2021_s2 + $0x94] ss:$12 sps:$4 sm:$0xff]  }
 0x10e   : > { %v657_v16 = vpack.c.bf16 %v489_v15, %v486_v12  ;;  %v1651_v12 = vld [vmem:[%s2021_s2 + $0xb0] ss:$12 sps:$4 sm:$0xff]  }
 0x10f   : > { %v1650_v15 = vld [vmem:[%s2021_s2 + $0x90] ss:$12 sps:$4 sm:$0xff]  }
 0x112   : > { %v1529_v17 = vpop.f32.mrb[12].mxu0 }
 0x113   : > { %v502_v18 = vpop.f32.mrb[13].mxu0 }
 0x114   : > { %v1530_v19 = vpop.f32.mrb[14].mxu0 }
 0x115   : > { %v660_v20 = vpack.c.bf16 %v1530_v19, %v1529_v17  ;;  %v505_v21 = vpop.f32.mrb[15].mxu0  ;;  %v1652_v17 = vld [vmem:[%s2021_s2 + $0xac] ss:$12 sps:$4 sm:$0xff]   ;;  %v1656_v19 = vld [vmem:[%s2021_s2 + $0xc4] ss:$12 sps:$4 sm:$0xff]  }
 0x116   : > { %v659_v22 = vpack.c.bf16 %v505_v21, %v502_v18  ;;  %v1654_v18 = vld [vmem:[%s2021_s2 + $0xa8] ss:$12 sps:$4 sm:$0xff]  }
 0x117   : > { %v1660_v21 = vld [vmem:[%s2021_s2 + $0xdc] ss:$12 sps:$4 sm:$0xff]  }
 0x11a   : > { %v1533_v23 = vpop.f32.mrb[16].mxu0 }
 0x11b   : > { %v518_v24 = vpop.f32.mrb[17].mxu0 }
 0x11c   : > { %v1534_v25 = vpop.f32.mrb[18].mxu0 }
 0x11d   : > { %v662_v26 = vpack.c.bf16 %v1534_v25, %v1533_v23  ;;  %v521_v27 = vpop.f32.mrb[19].mxu0  ;;  %v1699_v23 = vmov 0.0|0.0  }
 0x11e   : > { %v661_v28 = vpack.c.bf16 %v521_v27, %v518_v24  ;;  %v1701_v24 = vmov 0.0  }
 0x120   : > { %1418 = vmatprep.subr.bf16.mxu1 %v661_v28 }
 0x121   : > { %1419 = vmatpush3.bf16.msra.mxu1 %v653_v4  ;;  %v1638_v4 = vld [vmem:[%s2021_s2 + $0x50] ss:$12 sps:$4 sm:$0xff]  }
 0x122   : > { %v1537_v29 = vpop.f32.mrb[20].mxu0  ;;  %1420 = vmatprep.subr.bf16.mxu1 %v662_v26 }
 0x123   : > { %v534_v30 = vpop.f32.mrb[21].mxu0 }
 0x124   : > { %v1538_v31 = vpop.f32.mrb[22].mxu0 }
 0x125   : > { %v664_v32 = vpack.c.bf16 %v1538_v31, %v1537_v29  ;;  %v537_v33 = vpop.f32.mrb[23].mxu0  ;;  %1421 = vmatpush3.bf16.msra.mxu1 %v654_v2  ;;  %v1636_v2 = vld [vmem:[%s2021_s2 + $0x38] ss:$12 sps:$4 sm:$0xff]  }
 0x126   : > { %v663_v34 = vpack.c.bf16 %v537_v33, %v534_v30 }
 0x128   : > { %1422 = vmatprep.subr.bf16.mxu1 %v663_v34 }
 0x129   : > { %1423 = vmatpush3.bf16.msra.mxu1 %v655_v10  ;;  %v1649_v10 = vld [vmem:[%s2021_s2 + $0x98] ss:$12 sps:$4 sm:$0xff]  }
 0x12a   : > { %v1541_v35 = vpop.f32.mrb[24].mxu0  ;;  %1424 = vmatprep.subr.bf16.mxu1 %v664_v32 }
 0x12b   : > { %v550_v36 = vpop.f32.mrb[25].mxu0 }
 0x12c   : > { %v1542_v37 = vpop.f32.mrb[26].mxu0 }
 0x12d   : > { %v666_v38 = vpack.c.bf16 %v1542_v37, %v1541_v35  ;;  %v553_v39 = vpop.f32.mrb[27].mxu0  ;;  %1425 = vmatpush3.bf16.msra.mxu1 %v656_v8  ;;  %v1643_v8 = vld [vmem:[%s2021_s2 + $0x80] ss:$12 sps:$4 sm:$0xff]  }
 0x12e   : > { %v665_v40 = vpack.c.bf16 %v553_v39, %v550_v36 }
 0x130   : > { %1426 = vmatprep.subr.bf16.mxu1 %v665_v40 }
 0x131   : > { %1427 = vmatpush3.bf16.msra.mxu1 %v657_v16  ;;  %v1658_v16 = vld [vmem:[%s2021_s2 + $0xe0] ss:$12 sps:$4 sm:$0xff]  }
 0x132   : > { %v1545_v41 = vpop.f32.mrb[28].mxu0  ;;  %1428 = vmatprep.subr.bf16.mxu1 %v666_v38 }
 0x133   : > { %v566_v42 = vpop.f32.mrb[29].mxu0 }
 0x134   : > { %v1546_v43 = vpop.f32.mrb[30].mxu0 }
 0x135   : > { %v668_v44 = vpack.c.bf16 %v1546_v43, %v1545_v41  ;;  %v569_v45 = vpop.f32.mrb[31].mxu0  ;;  %1429 = vmatpush3.bf16.msra.mxu1 %v658_v14  ;;  %v1655_v14 = vld [vmem:[%s2021_s2 + $0xc8] ss:$12 sps:$4 sm:$0xff]  }
 0x136   : > { %v667_v46 = vpack.c.bf16 %v569_v45, %v566_v42 }
 0x138   : > { %1430 = vmatprep.subr.bf16.mxu1 %v667_v46 }
 0x139   : > { %1431 = vmatpush3.bf16.msra.mxu1 %v659_v22  ;;  %v1662_v22 = vld [vmem:[%s2021_s2 + $0xd8] ss:$12 sps:$4 sm:$0xff]  }
 0x13a   : > { %v1549_v47 = vpop.f32.mrb[32].mxu0  ;;  %1432 = vmatprep.subr.bf16.mxu1 %v668_v44 }
 0x13b   : > { %v582_v48 = vpop.f32.mrb[33].mxu0 }
 0x13c   : > { %v1550_v49 = vpop.f32.mrb[34].mxu0 }
 0x13d   : > { %v670_v51 = vpack.c.bf16 %v1550_v49, %v1549_v47  ;;  %v585_v52 = vpop.f32.mrb[35].mxu0  ;;  %1433 = vmatpush3.bf16.msra.mxu1 %v660_v20  ;;  %v1659_v20 = vld [vmem:[%s2021_s2 + $0xc0] ss:$12 sps:$4 sm:$0xff]  }
 0x13e   : > { %v669_v54 = vpack.c.bf16 %v585_v52, %v582_v48  ;;  %1594 = vmatprep.subr.bf16.mxu1 %v1699_v23 }
 0x140   : > { %887 = vmatmul.mubr.bf16.vlgmr.msra.gmra.mrb[0].mxu1 %v1623_v50  ;;  %1555 = vmatprep.subr.bf16.mxu0 %v669_v54 }
 0x141   : > { %1556 = vmatpush3.bf16.msra.mxu0 %v669_v54  ;;  %894 = vmatprep.mubr.bf16.mxu1 %v1626_v53 }
 0x142   : > { %v1553_v55 = vpop.f32.mrb[36].mxu0  ;;  %1557 = vmatprep.subr.bf16.mxu0 %v670_v51 }
 0x143   : > { %v598_v56 = vpop.f32.mrb[37].mxu0 }
 0x144   : > { %v1554_v57 = vpop.f32.mrb[38].mxu0 }
 0x145   : > { %v672_v59 = vpack.c.bf16 %v1554_v57, %v1553_v55  ;;  %v601_v60 = vpop.f32.mrb[39].mxu0  ;;  %1558 = vmatpush3.bf16.msra.mxu0 %v670_v51 }
 0x146   : > { %v671_v62 = vpack.c.bf16 %v601_v60, %v598_v56 }
 0x148   : > { %895 = vmatmul.mubr.bf16.gmra.mrb[4].mxu1 %v1628_v58  ;;  %1559 = vmatprep.subr.bf16.mxu0 %v671_v62 }
 0x149   : > { %1560 = vmatpush3.bf16.msra.mxu0 %v671_v62  ;;  %902 = vmatprep.mubr.bf16.mxu1 %v1629_v61 }
 0x14a   : > { %1561 = vmatprep.subr.bf16.mxu0 %v672_v59 }
 0x14d   : > { %1562 = vmatpush3.bf16.msra.mxu0 %v672_v59 }
 0x150   : > { %903 = vmatmul.mubr.bf16.gmra.mrb[8].mxu1 %v1632_v63  ;;  %1564 = vmatmul.mubr.msk.bf16.vlgmr.msra.gmra.mrb[40].mxu0 %vm823_vm1, %v1633_v0 }
 0x151   : > { %910 = vmatprep.mubr.bf16.mxu1 %v1634_v1  ;;  %1567 = vmatprep.mubr.msk.bf16.mxu0 %vm823_vm1, %v1636_v2 }
 0x158   : > { %911 = vmatmul.mubr.bf16.gmra.mrb[12].mxu1 %v1637_v3  ;;  %1568 = vmatmul.mubr.msk.bf16.gmra.mrb[44].mxu0 %vm823_vm1, %v1638_v4 }
 0x159   : > { %918 = vmatprep.mubr.bf16.mxu1 %v1639_v5  ;;  %1571 = vmatprep.mubr.msk.bf16.mxu0 %vm823_vm1, %v1642_v6 }
 0x160   : > { %919 = vmatmul.mubr.bf16.gmra.mrb[16].mxu1 %v1641_v7  ;;  %1572 = vmatmul.mubr.msk.bf16.gmra.mrb[48].mxu0 %vm823_vm1, %v1643_v8 }
 0x161   : > { %926 = vmatprep.mubr.bf16.mxu1 %v1644_v9  ;;  %1575 = vmatprep.mubr.msk.bf16.mxu0 %vm823_vm1, %v1649_v10 }
 0x168   : > { %927 = vmatmul.mubr.bf16.gmra.mrb[20].mxu1 %v1646_v11  ;;  %1576 = vmatmul.mubr.msk.bf16.gmra.mrb[52].mxu0 %vm823_vm1, %v1651_v12 }
 0x169   : > { %934 = vmatprep.mubr.bf16.mxu1 %v1647_v13  ;;  %1579 = vmatprep.mubr.msk.bf16.mxu0 %vm823_vm1, %v1655_v14 }
 0x170   : > { %935 = vmatmul.mubr.bf16.gmra.mrb[24].mxu1 %v1650_v15  ;;  %1580 = vmatmul.mubr.msk.bf16.gmra.mrb[56].mxu0 %vm823_vm1, %v1658_v16 }
 0x171   : > { %942 = vmatprep.mubr.bf16.mxu1 %v1652_v17 }
 0x178   : > { %943 = vmatmul.mubr.bf16.gmra.mrb[28].mxu1 %v1654_v18 }
 0x179   : > { %950 = vmatprep.mubr.bf16.mxu1 %v1656_v19 }
 0x180   : > { %951 = vmatmul.mubr.bf16.gmra.mrb[32].mxu1 %v1659_v20 }
 0x181   : > { %958 = vmatprep.mubr.bf16.mxu1 %v1660_v21 }
 0x188   : > { %959 = vmatmul.mubr.bf16.gmra.mrb[36].mxu1 %v1662_v22 }
 0x189   : > { %1591 = vmatprep.mubr.msk.f32.mxu1 %vm1700_vm2, %v1701_v24 }
 0x213   : > { %v1434_v25 = vpop.f32.mrb[0].mxu1 }
 0x214   : > { %v1435_v26 = vpop.f32.mrb[1].mxu1 }
 0x215   : > { %v1436_v27 = vadd.f32 %v1435_v26, %v1434_v25  ;;  %v1437_v28 = vpop.f32.mrb[2].mxu1 }
 0x216   : > { %v1438_v29 = vpop.f32.mrb[3].mxu1 }
 0x217   : > { %v1439_v30 = vadd.f32 %v1438_v29, %v1437_v28 }
 0x21b   : > { %v1440_v31 = vpop.f32.mrb[4].mxu1 }
 0x21c   : > { %v1441_v32 = vpop.f32.mrb[5].mxu1 }
 0x21d   : > { %v1442_v33 = vadd.f32 %v1441_v32, %v1440_v31  ;;  %v1443_v34 = vpop.f32.mrb[6].mxu1 }
 0x21e   : > { %v1444_v35 = vpop.f32.mrb[7].mxu1 }
 0x21f   : > { %v1445_v36 = vadd.f32 %v1444_v35, %v1443_v34 }
 0x223   : > { %v1446_v37 = vpop.f32.mrb[8].mxu1  ;;  %v1565_v38 = vpop.f32.mrb[40].mxu0 }
 0x224   : > { %v1010_v39 = vadd.f32 %v1565_v38, %v1442_v33  ;;  %v1447_v40 = vpop.f32.mrb[9].mxu1  ;;  %v1001_v41 = vpop.f32.mrb[41].mxu0 }
 0x225   : > { %v1448_v42 = vadd.f32 %v1447_v40, %v1446_v37  ;;  %v1002_v43 = vadd.f32 %v1436_v27, %v1001_v41  ;;  %v1449_v44 = vpop.f32.mrb[10].mxu1  ;;  %v1566_v45 = vpop.f32.mrb[42].mxu0 }
 0x226   : > { %v1013_v46 = vadd.f32 %v1566_v45, %v1445_v36  ;;  %v1450_v47 = vpop.f32.mrb[11].mxu1  ;;  %v1004_v48 = vpop.f32.mrb[43].mxu0  ;;  %v1938_v3 = vmul.f32 %v1010_v39, %v1010_v39 }
 0x227   : > { %v1451_v49 = vadd.f32 %v1450_v47, %v1449_v44  ;;  %v1005_v50 = vadd.f32 %v1439_v30, %v1004_v48  ;;  %v1932_v59 = vmul.f32 %v1002_v43, %v1002_v43 }
 0x228   : > { %v1954_v14 = vmul.f32 %v1013_v46, %v1013_v46 }
 0x229   : > { %v1081_v7 = vmul.f32 %v1005_v50, %v1005_v50 }
 0x22b   : > { %v1452_v51 = vpop.f32.mrb[12].mxu1  ;;  %v1569_v52 = vpop.f32.mrb[44].mxu0 }
 0x22c   : > { %v1453_v53 = vpop.f32.mrb[13].mxu1  ;;  %v1017_v54 = vpop.f32.mrb[45].mxu0 }
 0x22d   : > { %v1454_v55 = vadd.f32 %v1453_v53, %v1452_v51  ;;  %v1018_v56 = vadd.f32 %v1448_v42, %v1017_v54  ;;  %v1455_v57 = vpop.f32.mrb[14].mxu1  ;;  %v1570_v58 = vpop.f32.mrb[46].mxu0 }
 0x22e   : > { %v1456_v60 = vpop.f32.mrb[15].mxu1  ;;  %v1020_v61 = vpop.f32.mrb[47].mxu0 }
 0x22f   : > { %v1026_v62 = vadd.f32 %v1569_v52, %v1454_v55  ;;  %v1934_v63 = vmul.f32 %v1018_v56, %v1018_v56  ;;  %v1936_v0 = vmul.f32 %v1018_v56, %v1002_v43  ;;  %v1457_v1 = vadd.f32 %v1456_v60, %v1455_v57 }
 0x230   : > { %v1021_v2 = vadd.f32 %v1451_v49, %v1020_v61  ;;  %v1974_v60 = vstv %s289_s10 }
 0x231   : > { %v1940_v4 = vmul.f32 %v1026_v62, %v1026_v62  ;;  %v1942_v5 = vmul.f32 %v1026_v62, %v1010_v39  ;;  %v1946_v6 = vadd.f32 %v1934_v63, %v1932_v59  ;;  %v1029_v8 = vadd.f32 %v1570_v58, %v1457_v1 }
 0x232   : > { %v1085_v9 = vmul.f32 %v1021_v2, %v1021_v2  ;;  %v1948_v10 = vmul.f32 %v1021_v2, %v1005_v50 }
 0x233   : > { %v1952_v11 = vadd.f32 %v1940_v4, %v1938_v3  ;;  %v1458_v12 = vpop.f32.mrb[16].mxu1  ;;  %v1573_v13 = vpop.f32.mrb[48].mxu0  ;;  %v1956_v15 = vmul.f32 %v1029_v8, %v1029_v8  ;;  %v1958_v16 = vmul.f32 %v1029_v8, %v1013_v46 }
 0x234   : > { %v1139_v17 = vadd.f32 %v1085_v9, %v1081_v7  ;;  %v1459_v18 = vpop.f32.mrb[17].mxu1  ;;  %v1033_v19 = vpop.f32.mrb[49].mxu0 }
 0x235   : > { %v1460_v20 = vadd.f32 %v1459_v18, %v1458_v12  ;;  %v1461_v21 = vpop.f32.mrb[18].mxu1  ;;  %v1574_v22 = vpop.f32.mrb[50].mxu0  ;;  %v1962_v24 = vadd.f32 %v1956_v15, %v1954_v14 }
 0x236   : > { %v1462_v25 = vpop.f32.mrb[19].mxu1  ;;  %v1036_v26 = vpop.f32.mrb[51].mxu0 }
 0x237   : > { %v1463_v27 = vadd.f32 %v1462_v25, %v1461_v21  ;;  %v1034_v28 = vadd.f32 %v1460_v20, %v1033_v19  ;;  %v1143_v21 = vadd.f32 %v1139_v17, %v1974_v60  ;;  %v1144_v17 = vadd.f32 %v1952_v11, %v1974_v60 }
 0x239   : > { %v1092_v29 = vsub.f32 %v1034_v28, %v1932_v59  ;;  %v1037_v30 = vadd.f32 %v1463_v27, %v1036_v26  ;;  %v1972_v59 = vstv %s1332_s9 }
 0x23b   : > { %v1093_v31 = vsub.f32 %v1037_v30, %v1081_v7  ;;  %v1464_v32 = vpop.f32.mrb[20].mxu1  ;;  %v1577_v33 = vpop.f32.mrb[52].mxu0 }
 0x23c   : > { %v1465_v34 = vpop.f32.mrb[21].mxu1  ;;  %v1049_v35 = vpop.f32.mrb[53].mxu0 }
 0x23d   : > { %v1466_v36 = vadd.f32 %v1465_v34, %v1464_v32  ;;  %v1467_v37 = vpop.f32.mrb[22].mxu1  ;;  %v1578_v38 = vpop.f32.mrb[54].mxu0 }
 0x23e   : > { %v1468_v39 = vpop.f32.mrb[23].mxu1  ;;  %v1052_v40 = vpop.f32.mrb[55].mxu0 }
 0x23f   : > { %v1042_v41 = vadd.f32 %v1573_v13, %v1466_v36  ;;  %v1469_v42 = vadd.f32 %v1468_v39, %v1467_v37  ;;  %v1142_v13 = vadd.f32 %v1946_v6, %v1974_v60 }
 0x241   : > { %v1094_v43 = vsub.f32 %v1042_v41, %v1938_v3  ;;  %v1045_v44 = vadd.f32 %v1574_v22, %v1469_v42 }
 0x243   : > { %v1095_v45 = vsub.f32 %v1045_v44, %v1954_v14  ;;  %v1470_v46 = vpop.f32.mrb[24].mxu1  ;;  %v1967_v47 = vpop.f32.mrb[56].mxu0  ;;  %v1125_v44 = vmul.f32 2.0, %v1936_v0 }
 0x244   : > { %v1471_v48 = vpop.f32.mrb[25].mxu1  ;;  %v1065_v49 = vpop.f32.mrb[57].mxu0 }
 0x245   : > { %v1472_v50 = vadd.f32 %v1471_v48, %v1470_v46  ;;  %v1473_v51 = vpop.f32.mrb[26].mxu1  ;;  %v1969_v52 = vpop.f32.mrb[58].mxu0 }
 0x246   : > { %v1474_v53 = vpop.f32.mrb[27].mxu1  ;;  %v1068_v54 = vpop.f32.mrb[59].mxu0 }
 0x247   : > { %v1050_v55 = vadd.f32 %v1472_v50, %v1049_v35  ;;  %v1475_v56 = vadd.f32 %v1474_v53, %v1473_v51 }
 0x249   : > { %v1096_v57 = vsub.f32 %v1050_v55, %v1934_v63  ;;  %v1053_v58 = vadd.f32 %v1475_v56, %v1052_v40 }
 0x24b   : > { %v1113_v61 = vadd.f32 %v1096_v57, %v1092_v29  ;;  %v1097_v62 = vsub.f32 %v1053_v58, %v1085_v9  ;;  %v1476_v1 = vpop.f32.mrb[28].mxu1 }
 0x24c   : > { %v1477_v2 = vpop.f32.mrb[29].mxu1 }
 0x24d   : > { %v1117_v3 = vadd.f32 %v1113_v61, %v1972_v59  ;;  %v1114_v7 = vadd.f32 %v1097_v62, %v1093_v31  ;;  %v1478_v8 = vadd.f32 %v1477_v2, %v1476_v1  ;;  %v1479_v12 = vpop.f32.mrb[30].mxu1 }
 0x24e   : > { %v1480_v14 = vpop.f32.mrb[31].mxu1 }
 0x24f   : > { %v1121_v18 = vadd.f32 1e-08, %v1117_v3  ;;  %v1118_v63 = vadd.f32 %v1114_v7, %v1972_v59  ;;  %v1058_v19 = vadd.f32 %v1577_v33, %v1478_v8  ;;  %v1481_v20 = vadd.f32 %v1480_v14, %v1479_v12 }
 0x250   : > { %v1127_v8 = vmul.f32 2.0, %v1942_v5 }
 0x251   : > { %v1146_v22 = vmul.f32 %v1142_v13, %v1121_v18  ;;  %v1122_v9 = vadd.f32 1e-08, %v1118_v63  ;;  %v1098_v25 = vsub.f32 %v1058_v19, %v1940_v4  ;;  %v1061_v26 = vadd.f32 %v1578_v38, %v1481_v20 }
 0x252   : > { %v1128_v63 = vmul.f32 2.0, %v1958_v16 }
 0x253   : > { %v1150_v27 = vadd.f32 1e-06, %v1146_v22  ;;  %v1147_v28 = vmul.f32 %v1143_v21, %v1122_v9  ;;  %v1115_v29 = vadd.f32 %v1098_v25, %v1094_v43  ;;  %v1099_v30 = vsub.f32 %v1061_v26, %v1956_v15  ;;  %v1482_v31 = vpop.f32.mrb[32].mxu1 }
 0x254   : > { %v1483_v6 = vpop.f32.mrb[33].mxu1  ;;  %v1145_v15 = vadd.f32 %v1962_v24, %v1974_v60  ;;  %v1132_v22 = vadd.f32 %v1974_v60, %v1127_v8 }
 0x255   : > { %1663 = vrcp.f32 %v1150_v27  ;;  %v1151_v32 = vadd.f32 1e-06, %v1147_v28  ;;  %v1119_v34 = vadd.f32 %v1115_v29, %v1972_v59  ;;  %v1116_v33 = vadd.f32 %v1099_v30, %v1095_v45  ;;  %v1485_v35 = vpop.f32.mrb[34].mxu1 }
 0x256   : > { %v1484_v36 = vadd.f32 %v1483_v6, %v1482_v31  ;;  %v1486_v37 = vpop.f32.mrb[35].mxu1  ;;  %v1126_v45 = vmul.f32 2.0, %v1948_v10  ;;  %v1133_v27 = vadd.f32 %v1974_v60, %v1128_v63  ;;  %v1162_v6 = vld [vmem:[%s2022_s3] sm:$0xf] }
 0x257   : > { %1665 = vrcp.f32 %v1151_v32  ;;  %v1123_v4 = vadd.f32 1e-08, %v1119_v34  ;;  %v1120_v38 = vadd.f32 %v1116_v33, %v1972_v59  ;;  %v1487_v39 = vadd.f32 %v1486_v37, %v1485_v35 }
 0x258   : > { %v1066_v40 = vadd.f32 %v1484_v36, %v1065_v49  ;;  %v1131_v58 = vadd.f32 %v1974_v60, %v1126_v45 }
 0x259   : > { %v1148_v41 = vmul.f32 %v1144_v17, %v1123_v4  ;;  %v1124_v42 = vadd.f32 1e-08, %v1120_v38  ;;  %v1069_v43 = vadd.f32 %v1487_v39, %v1068_v54  ;;  %v1130_v54 = vadd.f32 %v1974_v60, %v1125_v44 }
 0x25a   : > { %v1100_v11 = vsub.f32 %v1066_v40, %v1936_v0 }
 0x25b   : > { %v1152_v46 = vadd.f32 1e-06, %v1148_v41  ;;  %v1149_v48 = vmul.f32 %v1145_v15, %v1124_v42  ;;  %v1101_v50 = vsub.f32 %v1069_v43, %v1948_v10  ;;  %v1488_v51 = vpop.f32.mrb[36].mxu1 }
 0x25c   : > { %v1104_v53 = vmul.f32 2.0, %v1100_v11  ;;  %v1489_v55 = vpop.f32.mrb[37].mxu1 }
 0x25d   : > { %1667 = vrcp.f32 %v1152_v46  ;;  %v1153_v49 = vadd.f32 1e-06, %v1149_v48  ;;  %v1105_v56 = vmul.f32 2.0, %v1101_v50  ;;  %v1490_v24 = vadd.f32 %v1489_v55, %v1488_v51  ;;  %v1491_v57 = vpop.f32.mrb[38].mxu1 }
 0x25e   : > { %v1109_v61 = vadd.f32 %v1972_v59, %v1104_v53  ;;  %v1492_v62 = vpop.f32.mrb[39].mxu1 }
 0x25f   : > { %v1664_v0 = vpop.eup %1663  ;;  %1669 = vrcp.f32 %v1153_v49  ;;  %v1110_v1 = vadd.f32 %v1972_v59, %v1105_v56  ;;  %v1074_v10 = vadd.f32 %v1967_v47, %v1490_v24  ;;  %v1493_v2 = vadd.f32 %v1492_v62, %v1491_v57 }
 0x260   : > { %v1134_v3 = vmul.f32 %v1130_v54, %v1109_v61 }
 0x261   : > { %v1666_v7 = vpop.eup %1665  ;;  %v1135_v12 = vmul.f32 %v1131_v58, %v1110_v1  ;;  %v1102_v13 = vsub.f32 %v1074_v10, %v1942_v5  ;;  %v1077_v14 = vadd.f32 %v1969_v52, %v1493_v2 }
 0x262   : > { %v1155_v18 = vmul.f32 %v1664_v0, %v1134_v3 }
 0x263   : > { %v1106_v19 = vmul.f32 2.0, %v1102_v13  ;;  %v1103_v20 = vsub.f32 %v1077_v14, %v1958_v16  ;;  %v1157_v21 = vmul.f32 %v1666_v7, %v1135_v12 }
 0x265   : > { %v1111_v47 = vadd.f32 %v1972_v59, %v1106_v19  ;;  %v1107_v9 = vmul.f32 2.0, %v1103_v20  ;;  %v1595_v25 = vpack.c.bf16 %v1157_v21, %v1155_v18 }
 0x267   : > { %v1668_v26 = vpop.eup %1667  ;;  %v1136_v28 = vmul.f32 %v1132_v22, %v1111_v47  ;;  %v1112_v5 = vadd.f32 %v1972_v59, %v1107_v9  ;;  %1596 = vmatpush3.bf16.msra.mxu1 %v1595_v25 }
 0x268   : > { %1597 = vmatprep.subr.bf16.mxu1 %v1699_v23 }
 0x269   : > { %v1670_v52 = vpop.eup %1669  ;;  %v1137_v16 = vmul.f32 %v1133_v27, %v1112_v5  ;;  %v1159_v29 = vmul.f32 %v1668_v26, %v1136_v28 }
 0x26b   : > { %v1161_v30 = vmul.f32 %v1670_v52, %v1137_v16 }
 0x26d   : > { %v1598_v31 = vpack.c.bf16 %v1161_v30, %v1159_v29 }
 0x26f   : > { %1599 = vmatpush3.bf16.msra.mxu1 %v1598_v31 }
 0x272   : > { %1592 = vmatmul.mubr.msk.f32.vlgmr.msra.gmra.mrb[40].mxu1 %vm1163_vm3, %v1162_v6 }
 0x345   : > { %v1233_v60 = vpop.f32.mrb[40].mxu1 }
 0x346   : > { %v1593_v59 = vpop.f32.mrb[41].mxu1  ;;  %v1238_v32 = vsel %vm1237_vm4, %v1233_v60, 0.0 }
 0x347   : > { %1239 = vadd.xlane.f32.xlu0 %v1238_v32 }
 0x3d4   : > { %v1240_v23 = vpop.xlane.xlu0 %1239 }
 0x3d5   : > { %1242 = vst.msk [vmem:[%s287_s16] sm:$0xf] %vm1241_vm5, %v1240_v23 }
 0x3d6 PF: > { %s17_s21 = sadd.s32 1, %s1696_s21  }
 0x3d7   : > { %p14_p2 = scmp.ge.s32.totalorder %s17_s21, 4  }
 0x3d9   :  { %16 = sbr.rel (!%p14_p2) target bundleno = 1 (0x1), region = 82 }
 0x3e0   :  { %1262 = vsyncpa [#allocation3], 1 }
 0x3e1   :  { %1264 = vsyncpa [#allocation3 + $0x1], 1 }

</bundles_post_ra>
